<compile_context>
chip_gen: v7x
topology: tpu7x:2x2x1
jax: 0.10.0
libtpu: 0.0.40
codegen_flags: <defaults>
</compile_context>

<pallas_src>
import math
from functools import partial

import jax
import jax.numpy as jnp
import numpy as np
from jax import lax
from jax.experimental import pallas as pl
from jax.experimental.pallas import tpu as pltpu


# ----------------------------------------------------------------------------
# Buffer construction (plain JAX glue -- mirrors PositionalEncoding.__init__)
# ----------------------------------------------------------------------------
def make_positional_encoding_table(max_len: int, d_model: int) -> jnp.ndarray:
    """Builds the [max_len, d_model] sinusoidal table (the `pe` buffer)."""
    position = jnp.arange(max_len, dtype=jnp.float32)[:, None]            # [L, 1]
    div_term = jnp.exp(
        jnp.arange(0, d_model, 2, dtype=jnp.float32)
        * (-math.log(10000.0) / d_model)
    )                                                                     # [D/2]
    pe = jnp.zeros((max_len, d_model), dtype=jnp.float32)
    pe = pe.at[:, 0::2].set(jnp.sin(position * div_term))
    pe = pe.at[:, 1::2].set(jnp.cos(position * div_term))
    return pe


# ----------------------------------------------------------------------------
# In-kernel helpers
# ----------------------------------------------------------------------------
def _bcast_pe(pe, *, dense_3d: bool, batch: int):
    """Broadcast a (bs, D) pe tile across the batch dimension, in VMEM."""
    if dense_3d:
        return pe[:, None, :]                       # (bs, 1, D) sublane broadcast
    if batch == 1:
        return pe
    return jnp.concatenate([pe] * batch, axis=1)    # (bs, B*D) lane concat


def _keep_mask(shape, seed_u32, threshold31: int):
    """Counter-based RNG: splitmix32 hash of the global element index.

    Portable (plain jnp integer ops), deterministic per (seed, element), and
    cheap enough to hide under HBM DMA on this mem-bound kernel.
    """
    row0 = (pl.program_id(0) * shape[0]).astype(jnp.uint32)   # block row offset
    idx = lax.broadcasted_iota(jnp.int32, shape, 0).astype(jnp.uint32) + row0
    for d in range(1, len(shape)):
        idx = idx * jnp.uint32(shape[d]) + \
              lax.broadcasted_iota(jnp.int32, shape, d).astype(jnp.uint32)
    h = idx * jnp.uint32(0x9E3779B1) + seed_u32 * jnp.uint32(0x85EBCA77)
    h = (h ^ (h >> 16)) * jnp.uint32(0x7FEB352D)
    h = (h ^ (h >> 15)) * jnp.uint32(0x846CA68B)
    h = h ^ (h >> 16)
    bits31 = (h >> 1).astype(jnp.int32)             # uniform in [0, 2^31)
    return bits31 >= jnp.int32(threshold31)         # P(keep) = 1 - p
    # TODO(synk): on v7x, if this flips VALU-bound for bf16 inputs, derive 2-4
    # keep decisions from sub-fields of each 32-bit hash instead of one/element.


# ----------------------------------------------------------------------------
# Kernels
# ----------------------------------------------------------------------------
def _pe_add_kernel(x_ref, pe_ref, o_ref, *, dense_3d: bool, batch: int):
    """Eval path: y = x + pe (no RNG, no scalar prefetch)."""
    x = x_ref[...].astype(jnp.float32)
    pe = _bcast_pe(pe_ref[...].astype(jnp.float32), dense_3d=dense_3d, batch=batch)
    o_ref[...] = (x + pe).astype(o_ref.dtype)


def _pe_add_dropout_kernel(seed_ref, x_ref, pe_ref, o_ref, *,
                           dense_3d: bool, batch: int,
                           threshold31: int, inv_keep: float):
    """Training path: y = inverted-dropout(x + pe)."""
    x = x_ref[...].astype(jnp.float32)
    pe = _bcast_pe(pe_ref[...].astype(jnp.float32), dense_3d=dense_3d, batch=batch)
    y = x + pe
    keep = _keep_mask(y.shape, seed_ref[0].astype(jnp.uint32), threshold31)
    y = jnp.where(keep, y * jnp.float32(inv_keep), jnp.zeros_like(y))
    o_ref[...] = y.astype(o_ref.dtype)


# ----------------------------------------------------------------------------
# Tile sizing (byte-aware, generation-aware, megacore-friendly)
# ----------------------------------------------------------------------------
def _tile_target_bytes() -> int:
    """~4 MiB x tiles on v6e/v7x, ~2 MiB on v5e / unknown backends."""
    try:
        kind = jax.devices()[0].device_kind.lower()
    except Exception:
        return 2 << 20
    if ("v6" in kind) or ("v7" in kind) or ("tpu7" in kind):
        return 4 << 20
    return 2 << 20


def _choose_block_seq(S: int, row_bytes: int, *,
                      target_bytes: int, min_steps: int = 4) -> int:
    """Largest seq tile that (a) divides S, (b) is sublane aligned (multiple of
    8 or the full S), (c) keeps tile bytes <= target, and (d) when the problem
    allows, leaves >= min_steps grid steps (>= 2 per TensorCore on v7x)."""
    divisors = [d for d in range(1, S + 1) if S % d == 0]
    aligned = [d for d in divisors if d % 8 == 0 or d == S] or divisors
    fitting = [d for d in aligned if d * row_bytes <= target_bytes] or [min(aligned)]
    multi = [d for d in fitting if S // d >= min_steps]
    return max(multi) if multi else max(fitting)


# ----------------------------------------------------------------------------
# Wrapper
# ----------------------------------------------------------------------------
def positional_encoding_forward(
    x: jnp.ndarray,
    pe: jnp.ndarray,
    *,
    dropout_p: float = 0.1,
    training: bool = False,
    seed: int = 0,
    block_seq: int | None = None,
) -> jnp.ndarray:
    """x: [seq_len, batch, d_model], pe: [>=seq_len, d_model] -> same shape as x."""
    S, B, D = x.shape
    # pe stays [S, D] in x.dtype: only S*D bytes of HBM traffic (no tiling).
    # NOTE: for best perf, cache this slice/cast per (S, dtype) across calls.
    pe_in = pe[:S].astype(x.dtype)

    itemsize = jnp.dtype(x.dtype).itemsize
    sublanes = 8 * max(1, 4 // itemsize)            # rows/vreg for this dtype
    # dtype-aware layout choice: keep 3-D only when both lanes (D) and sublanes
    # (B) are dense for this dtype; otherwise flatten to a lane-denser 2-D slab.
    dense_3d = (D % 128 == 0) and (B % sublanes == 0)

    if dense_3d:
        x_in = x
        x_block = lambda bs: (bs, B, D)
        x_idx = lambda i, *_: (i, 0, 0)
        out_shape = (S, B, D)
    else:
        x_in = x.reshape(S, B * D)                  # free row-major flatten
        x_block = lambda bs: (bs, B * D)
        x_idx = lambda i, *_: (i, 0)
        out_shape = (S, B * D)
    pe_block = lambda bs: (bs, D)
    pe_idx = lambda i, *_: (i, 0)
    out_struct = jax.ShapeDtypeStruct(out_shape, x.dtype)

    row_bytes = B * D * itemsize
    if block_seq is None:
        block_seq = _choose_block_seq(S, row_bytes, target_bytes=_tile_target_bytes())
    assert S % block_seq == 0, "seq_len must be divisible by the seq tile"
    assert block_seq % 8 == 0 or block_seq == S, "seq tile must be sublane aligned"
    grid = (S // block_seq,)
    cparams = pltpu.CompilerParams(dimension_semantics=("parallel",))

    p = float(dropout_p)
    apply_dropout = bool(training) and p > 0.0
    if apply_dropout and p >= 1.0:
        return jnp.zeros_like(x)                    # everything dropped

    if not apply_dropout:
        # Eval path: no scalar prefetch, pure add + store.
        out = pl.pallas_call(
            partial(_pe_add_kernel, dense_3d=dense_3d, batch=B),
            out_shape=out_struct,
            grid=grid,
            in_specs=[pl.BlockSpec(x_block(block_seq), x_idx),
                      pl.BlockSpec(pe_block(block_seq), pe_idx)],
            out_specs=pl.BlockSpec(x_block(block_seq), x_idx),
            compiler_params=cparams,
        )(x_in, pe_in)
    else:
        threshold31 = min(max(int(round(p * 2.0 ** 31)), 0), 2 ** 31 - 1)
        kernel = partial(_pe_add_dropout_kernel, dense_3d=dense_3d, batch=B,
                         threshold31=threshold31, inv_keep=1.0 / (1.0 - p))
        grid_spec = pltpu.PrefetchScalarGridSpec(
            num_scalar_prefetch=1,
            grid=grid,
            in_specs=[pl.BlockSpec(x_block(block_seq), x_idx),
                      pl.BlockSpec(pe_block(block_seq), pe_idx)],
            out_specs=pl.BlockSpec(x_block(block_seq), x_idx),
        )
        out = pl.pallas_call(
            kernel,
            out_shape=out_struct,
            grid_spec=grid_spec,
            compiler_params=cparams,
        )(jnp.asarray([seed], dtype=jnp.int32), x_in, pe_in)

    return out.reshape(S, B, D)


# ----------------------------------------------------------------------------
# Demo / correctness check
# ----------------------------------------------------------------------------
if __name__ == "__main__":
    seq_len, batch, d_model = 8, 2, 32

    key = jax.random.PRNGKey(0)
    x = jax.random.normal(key, (seq_len, batch, d_model), dtype=jnp.float32)

    # max_len == seq_len so the PyTorch slice/broadcast is reproduced exactly.
    pe = make_positional_encoding_table(max_len=seq_len, d_model=d_model)

    # --- eval mode (dropout == identity, like module.eval()) ---
    out = positional_encoding_forward(x, pe, dropout_p=0.1, training=False)
    out = jax.block_until_ready(out)

    ref = x + pe[:seq_len][:, None, :]
    np.testing.assert_allclose(np.asarray(out), np.asarray(ref),
                               rtol=1e-6, atol=1e-6)

    # --- training mode (exercises the dropout path) ---
    # Cannot bit-match torch's RNG stream; check the dropout invariants instead:
    # every element is either 0 (dropped) or (x+pe)/(1-p) (kept), and the drop
    # fraction is plausible for p=0.1.
    p = 0.1
    out_tr = positional_encoding_forward(x, pe, dropout_p=p, training=True, seed=123)
    out_tr = np.asarray(jax.block_until_ready(out_tr))
    ref_np = np.asarray(ref)
    scaled = ref_np / (1.0 - p)
    is_zero = np.isclose(out_tr, 0.0, atol=1e-6)
    is_scaled = np.isclose(out_tr, scaled, rtol=1e-5, atol=1e-6)
    assert np.all(is_zero | is_scaled), "dropout output not {0, scaled(x+pe)} valued"
    frac = is_zero.mean()
    assert 0.0 < frac < 0.5, f"implausible drop fraction {frac:.3f}"

    print("KERNEL_OK")
</pallas_src>

<mosaic_0001>
module attributes {stable_mosaic.version = 11 : i64} {
  func.func @_pe_add_kernel(%arg0: i32, %arg1: memref<8x64xf32, #tpu.memory_space<vmem>>, %arg2: memref<8x32xf32, #tpu.memory_space<vmem>>, %arg3: memref<8x64xf32, #tpu.memory_space<vmem>>) attributes {dimension_semantics = [#tpu.dimension_semantics<parallel>], iteration_bounds = array<i64: 1>, scalar_prefetch = 0 : i64, scratch_operands = 0 : i64, tpu.core_type = #tpu.core_type<tc>, window_params = [{transform_indices = @transform_0, window_bounds = array<i64: 8, 64>}, {transform_indices = @transform_1, window_bounds = array<i64: 8, 32>}, {transform_indices = @transform_2, window_bounds = array<i64: 8, 64>}]} {
    %c0 = arith.constant 0 : index
    %c0_0 = arith.constant 0 : index
    %0 = vector.load %arg1[%c0, %c0_0] : memref<8x64xf32, #tpu.memory_space<vmem>>, vector<8x64xf32>
    %c0_1 = arith.constant 0 : index
    %c0_2 = arith.constant 0 : index
    %1 = vector.load %arg2[%c0_1, %c0_2] : memref<8x32xf32, #tpu.memory_space<vmem>>, vector<8x32xf32>
    %2 = tpu.concatenate %1, %1 in 1 : vector<8x32xf32>, vector<8x32xf32> -> vector<8x64xf32>
    %3 = arith.addf %0, %2 : vector<8x64xf32>
    %c0_3 = arith.constant 0 : index
    %c0_4 = arith.constant 0 : index
    %4 = vector.load %arg3[%c0_3, %c0_4] : memref<8x64xf32, #tpu.memory_space<vmem>>, vector<8x64xf32>
    tpu.vector_store %arg3[%c0_3, %c0_4], %3 {strides = array<i32>} : memref<8x64xf32, #tpu.memory_space<vmem>>, vector<8x64xf32>,
    return
  }
  func.func @transform_0(%arg0: i32) -> (i32, i32) {
    %c0_i32 = arith.constant 0 : i32
    %c0_i32_0 = arith.constant 0 : i32
    return %arg0, %c0_i32 : i32, i32
  }
  func.func @transform_1(%arg0: i32) -> (i32, i32) {
    %c0_i32 = arith.constant 0 : i32
    %c0_i32_0 = arith.constant 0 : i32
    return %arg0, %c0_i32 : i32, i32
  }
  func.func @transform_2(%arg0: i32) -> (i32, i32) {
    %c0_i32 = arith.constant 0 : i32
    %c0_i32_0 = arith.constant 0 : i32
    return %arg0, %c0_i32 : i32, i32
  }
}

</mosaic_0001>

<bundles_post_ra>
// kernel: tpu_custom_call.1
= control target key start
LH: loop header
LB: loop body
LE: loop exit
PB: predicated region body
PF: predicated region fallthrough
CT: control target
= control target key end

     0   :  { %7 = vsyncpa [#allocation3], 0  ;;  %s194_s0 = inlined_call_operand.hbm [shape: f32[8,64], index: 0, kind: input, shape index: {}]   ;;  %s195_s1 = inlined_call_operand.hbm [shape: f32[8,32], index: 1, kind: input, shape index: {}]   ;;  %s196_s2 = inlined_call_operand.hbm [shape: f32[8,64], index: 2, kind: output, shape index: {}]  }
   0x1   :  { %8 = vsyncpa [#allocation6], 0 }
   0x2   :  { %9 = vsyncpa [#allocation4], 0  ;;  %s139_s9 = smov [#allocation2]   ;;  %s140_s11 = smov [#allocation5]  }
   0x3   :  { %s16_s10 = sshll.u32 %s139_s9, 4  ;;  %s26_s12 = sshll.u32 %s140_s11, 4  ;;  %s17_s10 = int_to_ptr.vmem [resolvable:$true] %s16_s10  ;;  %s27_s12 = int_to_ptr.vmem [resolvable:$true] %s26_s12 }
   0x4   :  { %s67_s15 = scalar_lea.hbm %s194_s0, 128 }
   0x5   :  { %p68_p0 = scmp.ne.s32.totalorder %s194_s0, %s67_s15  ;;  %p71_p1 = scmp.lt.u32.totalorder %s67_s15, %s194_s0 }
   0x7   :  { %p73_p2 = pnand %p71_p1, %p68_p0 }
   0x9   :  { %76 = shalt.err (!%p73_p2)
}
   0xa   :  { %s77_s20 = scalar_lea.vmem %s17_s10, 128  ;;  %p82_p4 = scmp.lt.s32.totalorder %s17_s10, %s17_s10 }
   0xb   :  { %p78_p3 = scmp.ne.s32.totalorder %s17_s10, %s77_s20  ;;  %p83_p5 = scmp.lt.s32.totalorder %s77_s20, %s77_s20 }
   0xd   :  { %p84_p6 = por %p83_p5, %p82_p4 }
   0xf   :  { %p85_p7 = pnand %p84_p6, %p78_p3 }
  0x11   :  { %88 = shalt.err (!%p85_p7)
}
  0x12   :  { %19 = dma.hbm_to_vmem [thread:$0]  %s194_s0, 128, %s17_s10, [#allocation3]  }
  0x13   :  { %s89_s25 = scalar_lea.hbm %s195_s1, 128 }
  0x14   :  { %p90_p8 = scmp.ne.s32.totalorder %s195_s1, %s89_s25  ;;  %p93_p9 = scmp.lt.u32.totalorder %s89_s25, %s195_s1 }
  0x16   :  { %p95_p10 = pnand %p93_p9, %p90_p8 }
  0x18   :  { %98 = shalt.err (!%p95_p10)
}
  0x19   :  { %s99_s30 = scalar_lea.vmem %s27_s12, 128  ;;  %p104_p12 = scmp.lt.s32.totalorder %s27_s12, %s27_s12 }
  0x1a   :  { %p100_p11 = scmp.ne.s32.totalorder %s27_s12, %s99_s30  ;;  %p105_p13 = scmp.lt.s32.totalorder %s99_s30, %s99_s30 }
  0x1c   :  { %p106_p0 = por %p105_p13, %p104_p12 }
  0x1e   :  { %p107_p1 = pnand %p106_p0, %p100_p11 }
  0x20   :  { %110 = shalt.err (!%p107_p1)
}
  0x21   :  { %29 = dma.hbm_to_vmem [thread:$0]  %s195_s1, 128, %s27_s12, [#allocation6]  }
  0x22   :  { %133 = dma.done.wait [#allocation3], 128  }
  0x23   :  { %134 = vsyncadd [#allocation3], 4294967168 }
  0x24   :  { %135 = dma.done.wait [#allocation6], 128  }
  0x25   :  { %136 = vsyncadd [#allocation6], 4294967168  ;;  %v37_v0 = vld [vmem:[#allocation5] sm:$0xff]  ;;  %s141_s4 = smov 32   ;;  %vm42_vm0 = vcmask 261120   ;;  %v36_v1 = vld [vmem:[#allocation2] sm:$0xff] }
  0x26   :  { %39 = vrot.lane.b32.xlu0 %v37_v0, %s141_s4  ;;  %s142_s5 = smov [#allocation7]   ;;  %vm45_vm1 = vcmask 523264  }
  0x27   :  { %s53_s6 = sshll.u32 %s142_s5, 4  ;;  %s54_s6 = int_to_ptr.vmem [resolvable:$true] %s53_s6 }
  0x28   :  { %s111_s7 = scalar_lea.vmem %s54_s6, 128  ;;  %p116_p3 = scmp.lt.s32.totalorder %s54_s6, %s54_s6 }
  0x29   :  { %p112_p2 = scmp.ne.s32.totalorder %s54_s6, %s111_s7  ;;  %p117_p4 = scmp.lt.s32.totalorder %s111_s7, %s111_s7 }
  0x2b   :  { %p118_p5 = por %p117_p4, %p116_p3 }
  0x2d   :  { %p119_p6 = pnand %p118_p5, %p112_p2 }
  0x98   :  { %v40_v2 = vpop.permute.xlu0 %39 }
  0x99   :  { %v43_v3 = vsel %vm42_vm0, %v37_v0, %v40_v2 }
  0x9a   :  { %v44_v4 = vadd.f32 %v43_v3, %v36_v1 }
  0x9c   :  { %46 = vst.msk [vmem:[#allocation7] sm:$0xff] %vm45_vm1, %v44_v4 }
  0x9d   :  { %122 = shalt.err (!%p119_p6)
}
  0x9e   :  { %s123_s9 = scalar_lea.hbm %s196_s2, 128 }
  0x9f   :  { %p124_p7 = scmp.ne.s32.totalorder %s196_s2, %s123_s9  ;;  %p127_p8 = scmp.lt.u32.totalorder %s123_s9, %s196_s2 }
  0xa1   :  { %p129_p9 = pnand %p127_p8, %p124_p7 }
  0xa3   :  { %132 = shalt.err (!%p129_p9)
}
  0xa4   :  { %56 = dma.vmem_to_hbm [thread:$0]  %s54_s6, 128, %s196_s2, [#allocation4]  }
  0xa5   :  { %137 = dma.done.wait [#allocation4], 128  }
  0xa6   :  { %138 = vsyncadd [#allocation4], 4294967168 }
  0xa7   :  { %60 = vsyncpa [#allocation3], 1 }
  0xa8   :  { %61 = vsyncpa [#allocation6], 1 }
  0xa9   :  { %62 = vsyncpa [#allocation4], 1 }

</bundles_post_ra>
